<compile_context>
chip_gen: v7x
topology: tpu7x:2x2x1
jax: 0.10.0
libtpu: 0.0.40
codegen_flags: <defaults>
</compile_context>

<pallas_src>
import jax
import jax.numpy as jnp
from jax.experimental import pallas as pl
from jax.experimental.pallas import tpu as pltpu


# ----------------------------- Pallas kernels ------------------------------ #

def _mm_kernel(p_ref, w_ref, s_ref, b_ref, o_ref, acc_ref):
    # out = relu((patches @ W) * bn_scale + bn_shift)
    @pl.when(pl.program_id(2) == 0)
    def _init():
        acc_ref[...] = jnp.zeros_like(acc_ref)

    acc_ref[...] += jnp.dot(p_ref[...], w_ref[...],
                            preferred_element_type=jnp.float32)

    @pl.when(pl.program_id(2) == pl.num_programs(2) - 1)
    def _finalize():
        y = acc_ref[...] * s_ref[...] + b_ref[...]
        o_ref[...] = jnp.maximum(y, 0.0).astype(o_ref.dtype)


def _mm_res_kernel(p_ref, w_ref, s_ref, b_ref, r_ref, o_ref, acc_ref):
    # out = relu((patches @ W) * bn_scale + bn_shift + residual)
    @pl.when(pl.program_id(2) == 0)
    def _init():
        acc_ref[...] = jnp.zeros_like(acc_ref)

    acc_ref[...] += jnp.dot(p_ref[...], w_ref[...],
                            preferred_element_type=jnp.float32)

    @pl.when(pl.program_id(2) == pl.num_programs(2) - 1)
    def _finalize():
        y = (acc_ref[...] * s_ref[...] + b_ref[...]
             + r_ref[...].astype(jnp.float32))
        o_ref[...] = jnp.maximum(y, 0.0).astype(o_ref.dtype)


def _mm_proj_kernel(p_ref, w_ref, s_ref, b_ref,
                    xsc_ref, wsc_ref, ssc_ref, bsc_ref, o_ref, acc_ref):
    # out = relu((patches @ W2)*s2 + b2 + (xsc @ Wsc)*ssc + bsc)
    @pl.when(pl.program_id(2) == 0)
    def _init():
        acc_ref[...] = jnp.zeros_like(acc_ref)

    acc_ref[...] += jnp.dot(p_ref[...], w_ref[...],
                            preferred_element_type=jnp.float32)

    @pl.when(pl.program_id(2) == pl.num_programs(2) - 1)
    def _finalize():
        sc = jnp.dot(xsc_ref[...], wsc_ref[...],
                     preferred_element_type=jnp.float32)
        y = (acc_ref[...] * s_ref[...] + b_ref[...]
             + sc * ssc_ref[...] + bsc_ref[...])
        o_ref[...] = jnp.maximum(y, 0.0).astype(o_ref.dtype)


# ------------------------- tiled matmul wrapper ----------------------------- #

def _round_up(x, m):
    return (x + m - 1) // m * m


def _pick_tile(dim, base, max_tile, prefer_split=False):
    """Return (tile, padded_dim) with tile % base == 0, padded_dim % tile == 0.

    Prefers the largest tile <= max_tile that exactly divides round_up(dim, base)
    (no extra zero-padding beyond base alignment); only pads further if the
    exact divisor would be pathologically small (and then at most ~12.5%).
    """
    padded = _round_up(dim, base)
    if padded <= max_tile:
        half = padded // 2
        if prefer_split and half >= base and half % base == 0:
            return half, padded          # >= 2 grid points for megacore / 2 TCs
        return padded, padded

    best = base
    t = (max_tile // base) * base
    while t >= base:
        if padded % t == 0:
            best = t
            break
        t -= base

    # Guard: if the only exact divisor is tiny, accept <=12.5% padding at the cap.
    if best * 8 <= max_tile:
        cap = (max_tile // base) * base
        alt = _round_up(padded, cap)
        if alt - padded <= padded // 8:
            return cap, alt
    return best, padded


def _pad2d(a, rows, cols, dtype=None):
    if dtype is not None:
        a = a.astype(dtype)
    return jnp.pad(a, ((0, rows - a.shape[0]), (0, cols - a.shape[1])))


def fused_conv_matmul(patches, weights, scale, shift,
                      residual=None, shortcut=None, out_dtype=jnp.float32):
    """relu((patches @ weights) * scale + shift [+ residual | + shortcut]).

    patches   [M, K]   bf16 im2col matrix
    weights   [K, N]   unscaled conv weights (cast to bf16 here)
    scale     [1, N]   f32 BN scale  (gamma / sqrt(var + eps))
    shift     [1, N]   f32 BN shift  (beta - mean * scale)
    residual  [M, N]   identity shortcut, added in the epilogue (bf16)
    shortcut  (xsc[M,C], wsc[C,N], ssc[1,N], bsc[1,N]) projection shortcut,
              fused as a separate dot (+ its own BN) in the epilogue.
    """
    M, K = patches.shape
    _, N = weights.shape

    TM, Mp = _pick_tile(M, 16, 1024, prefer_split=True)
    TK, Kp = _pick_tile(K, 128, 512)
    TN, Np = _pick_tile(N, 128, 512)

    p = _pad2d(patches, Mp, Kp, jnp.bfloat16)
    w = _pad2d(weights, Kp, Np, jnp.bfloat16)
    s = _pad2d(scale.reshape(1, -1), 1, Np, jnp.float32)
    b = _pad2d(shift.reshape(1, -1), 1, Np, jnp.float32)

    grid = (Mp // TM, Np // TN, Kp // TK)

    in_specs = [
        pl.BlockSpec((TM, TK), lambda i, j, k: (i, k)),
        pl.BlockSpec((TK, TN), lambda i, j, k: (k, j)),
        pl.BlockSpec((1, TN), lambda i, j, k: (0, j)),
        pl.BlockSpec((1, TN), lambda i, j, k: (0, j)),
    ]
    operands = [p, w, s, b]

    if shortcut is not None:
        xsc, wsc, ssc, bsc = shortcut
        Cp = _round_up(xsc.shape[1], 128)
        operands += [
            _pad2d(xsc, Mp, Cp, jnp.bfloat16),
            _pad2d(wsc, Cp, Np, jnp.bfloat16),
            _pad2d(ssc.reshape(1, -1), 1, Np, jnp.float32),
            _pad2d(bsc.reshape(1, -1), 1, Np, jnp.float32),
        ]
        in_specs += [
            pl.BlockSpec((TM, Cp), lambda i, j, k: (i, 0)),
            pl.BlockSpec((Cp, TN), lambda i, j, k: (0, j)),
            pl.BlockSpec((1, TN), lambda i, j, k: (0, j)),
            pl.BlockSpec((1, TN), lambda i, j, k: (0, j)),
        ]
        kernel = _mm_proj_kernel
    elif residual is not None:
        operands.append(_pad2d(residual, Mp, Np, jnp.bfloat16))
        in_specs.append(pl.BlockSpec((TM, TN), lambda i, j, k: (i, j)))
        kernel = _mm_res_kernel
    else:
        kernel = _mm_kernel

    out = pl.pallas_call(
        kernel,
        out_shape=jax.ShapeDtypeStruct((Mp, Np), out_dtype),
        grid=grid,
        in_specs=in_specs,
        out_specs=pl.BlockSpec((TM, TN), lambda i, j, k: (i, j)),
        scratch_shapes=[pltpu.VMEM((TM, TN), jnp.float32)],
        compiler_params=pltpu.CompilerParams(
            dimension_semantics=("parallel", "parallel", "arbitrary"),
            vmem_limit_bytes=48 * 1024 * 1024),
    )(*operands)

    return out[:M, :N]


# ------------------------------- JAX glue ---------------------------------- #

def _im2col(xp, kh, kw, stride, ho, wo):
    """xp: padded NHWC (bf16) -> [N*ho*wo, kh*kw*C] patches (kh, kw, c order)."""
    n, _, _, c = xp.shape
    cols = []
    for i in range(kh):
        for j in range(kw):
            patch = jax.lax.slice(
                xp,
                (0, i, j, 0),
                (n, i + stride * (ho - 1) + 1, j + stride * (wo - 1) + 1, c),
                (1, stride, stride, 1))
            cols.append(patch)
    return jnp.concatenate(cols, axis=-1).reshape(n * ho * wo, kh * kw * c)


def _fold_bn(gamma, beta, mean, var, eps=1e-5):
    scale = gamma / jnp.sqrt(var + eps)
    shift = beta - mean * scale
    return (scale.reshape(1, -1).astype(jnp.float32),
            shift.reshape(1, -1).astype(jnp.float32))


def basic_block_forward(x_nchw, params, stride):
    n, cin, h, w = x_nchw.shape
    cout = params["w1"].shape[0]
    ho = (h + 2 - 3) // stride + 1
    wo = (w + 2 - 3) // stride + 1

    # NHWC, bf16 activations (MXU operands are bf16; accumulation stays f32).
    x = jnp.transpose(x_nchw, (0, 2, 3, 1)).astype(jnp.bfloat16)

    # --- conv1 (3x3, stride, pad 1) + BN1 + ReLU ---  (bf16 intermediate) ---
    xp = jnp.pad(x, ((0, 0), (1, 1), (1, 1), (0, 0)))
    p1 = _im2col(xp, 3, 3, stride, ho, wo)
    s1, sh1 = _fold_bn(params["g1"], params["b1"], params["rm1"], params["rv1"])
    w1 = jnp.transpose(params["w1"], (2, 3, 1, 0)).reshape(9 * cin, cout)
    y1 = fused_conv_matmul(p1, w1, s1, sh1, out_dtype=jnp.bfloat16)
    y1 = y1.reshape(n, ho, wo, cout)

    # --- conv2 (3x3, stride 1, pad 1) + BN2 + shortcut + ReLU ---
    y1p = jnp.pad(y1, ((0, 0), (1, 1), (1, 1), (0, 0)))
    p2 = _im2col(y1p, 3, 3, 1, ho, wo)
    s2, sh2 = _fold_bn(params["g2"], params["b2"], params["rm2"], params["rv2"])
    w2 = jnp.transpose(params["w2"], (2, 3, 1, 0)).reshape(9 * cout, cout)

    if stride != 1 or cin != cout:
        # Projection shortcut (1x1 conv stride s + BN) fused as an epilogue dot.
        ssc, shsc = _fold_bn(params["gsc"], params["bsc"],
                             params["rmsc"], params["rvsc"])
        wsc = jnp.transpose(params["wsc"], (2, 3, 1, 0)).reshape(cin, cout)
        xsc = x[:, ::stride, ::stride, :].reshape(n * ho * wo, cin)
        out = fused_conv_matmul(p2, w2, s2, sh2,
                                shortcut=(xsc, wsc, ssc, shsc))
    else:
        # Identity shortcut: bf16 residual tile added in the epilogue.
        out = fused_conv_matmul(p2, w2, s2, sh2,
                                residual=x.reshape(n * ho * wo, cin))

    out = out.reshape(n, ho, wo, cout)
    return jnp.transpose(out, (0, 3, 1, 2))  # back to NCHW


basic_block = jax.jit(basic_block_forward, static_argnums=(2,))


# ----------------------------- Reference (XLA) ------------------------------ #

def _ref_forward(x_nchw, params, stride):
    def conv(x, wt, s, pad):
        return jax.lax.conv_general_dilated(
            x, wt, window_strides=(s, s), padding=((pad, pad), (pad, pad)),
            dimension_numbers=("NCHW", "OIHW", "NCHW"))

    def bn(x, g, b, m, v, eps=1e-5):
        r = lambda a: a.reshape(1, -1, 1, 1)
        return (x - r(m)) / jnp.sqrt(r(v) + eps) * r(g) + r(b)

    y = jax.nn.relu(bn(conv(x_nchw, params["w1"], stride, 1),
                       params["g1"], params["b1"], params["rm1"], params["rv1"]))
    y = bn(conv(y, params["w2"], 1, 1),
           params["g2"], params["b2"], params["rm2"], params["rv2"])
    cin, cout = x_nchw.shape[1], params["w1"].shape[0]
    if stride != 1 or cin != cout:
        sc = bn(conv(x_nchw, params["wsc"], stride, 0),
                params["gsc"], params["bsc"], params["rmsc"], params["rvsc"])
    else:
        sc = x_nchw
    return jax.nn.relu(y + sc)


# ------------------------------- Param init --------------------------------- #

def _init_bn(key, c):
    k1, k2, k3, k4 = jax.random.split(key, 4)
    return (jnp.ones((c,), jnp.float32) + 0.05 * jax.random.normal(k1, (c,)),
            0.05 * jax.random.normal(k2, (c,)),
            0.05 * jax.random.normal(k3, (c,)),
            jnp.ones((c,), jnp.float32) + 0.1 * jnp.abs(jax.random.normal(k4, (c,))))


def init_params(key, cin, cout, stride):
    ks = jax.random.split(key, 6)
    p = {"w1": 0.1 * jax.random.normal(ks[0], (cout, cin, 3, 3), jnp.float32),
         "w2": 0.1 * jax.random.normal(ks[1], (cout, cout, 3, 3), jnp.float32)}
    p["g1"], p["b1"], p["rm1"], p["rv1"] = _init_bn(ks[2], cout)
    p["g2"], p["b2"], p["rm2"], p["rv2"] = _init_bn(ks[3], cout)
    if stride != 1 or cin != cout:
        p["wsc"] = 0.1 * jax.random.normal(ks[4], (cout, cin, 1, 1), jnp.float32)
        p["gsc"], p["bsc"], p["rmsc"], p["rvsc"] = _init_bn(ks[5], cout)
    return p


# ---------------------------------- Main ------------------------------------ #

if __name__ == "__main__":
    key = jax.random.PRNGKey(0)
    kx, kp1, kp2 = jax.random.split(key, 3)

    # Case 1: projection shortcut (stride=2, channel change): 4 -> 8, 16x16 -> 8x8
    x = jax.random.normal(kx, (2, 4, 16, 16), jnp.float32)
    params1 = init_params(kp1, 4, 8, stride=2)
    out1 = basic_block(x, params1, 2)
    jax.block_until_ready(out1)
    ref1 = _ref_forward(x, params1, stride=2)
    assert out1.shape == (2, 8, 8, 8)
    assert jnp.allclose(out1, ref1, rtol=2e-2, atol=2e-2), (
        "max abs err %f" % float(jnp.max(jnp.abs(out1 - ref1))))

    # Case 2: identity shortcut (stride=1, in == out channels)
    y_in = jax.random.normal(kx, (2, 8, 8, 8), jnp.float32)
    params2 = init_params(kp2, 8, 8, stride=1)
    out2 = basic_block(y_in, params2, 1)
    jax.block_until_ready(out2)
    ref2 = _ref_forward(y_in, params2, stride=1)
    assert out2.shape == (2, 8, 8, 8)
    assert jnp.allclose(out2, ref2, rtol=2e-2, atol=2e-2), (
        "max abs err %f" % float(jnp.max(jnp.abs(out2 - ref2))))

    print("KERNEL_OK")
</pallas_src>

<mosaic_0001>
module attributes {stable_mosaic.version = 11 : i64} {
  func.func @_mm_kernel(%arg0: i32, %arg1: i32, %arg2: i32, %arg3: memref<64x128xbf16, #tpu.memory_space<vmem>>, %arg4: memref<128x128xbf16, #tpu.memory_space<vmem>>, %arg5: memref<1x128xf32, #tpu.memory_space<vmem>>, %arg6: memref<1x128xf32, #tpu.memory_space<vmem>>, %arg7: memref<64x128xbf16, #tpu.memory_space<vmem>>, %arg8: memref<64x128xf32, #tpu.memory_space<vmem>>) attributes {dimension_semantics = [#tpu.dimension_semantics<parallel>, #tpu.dimension_semantics<parallel>, #tpu.dimension_semantics<arbitrary>], iteration_bounds = array<i64: 2, 1, 1>, scalar_prefetch = 0 : i64, scratch_operands = 1 : i64, tpu.core_type = #tpu.core_type<tc>, window_params = [{transform_indices = @transform_0, window_bounds = array<i64: 64, 128>}, {transform_indices = @transform_1, window_bounds = array<i64: 128, 128>}, {transform_indices = @transform_2, window_bounds = array<i64: 1, 128>}, {transform_indices = @transform_3, window_bounds = array<i64: 1, 128>}, {transform_indices = @transform_4, window_bounds = array<i64: 64, 128>}]} {
    %c0_i32 = arith.constant 0 : i32
    %0 = arith.cmpi eq, %arg2, %c0_i32 : i32
    %1 = arith.extui %0 : i1 to i32
    %c0_i32_0 = arith.constant 0 : i32
    %2 = arith.cmpi ne, %1, %c0_i32_0 : i32
    scf.if %2 {
      %cst_10 = arith.constant 0.000000e+00 : f32
      %12 = vector.broadcast %cst_10 : f32 to vector<64x128xf32>
      %c0_11 = arith.constant 0 : index
      %c0_12 = arith.constant 0 : index
      %13 = vector.load %arg8[%c0_11, %c0_12] : memref<64x128xf32, #tpu.memory_space<vmem>>, vector<64x128xf32>
      tpu.vector_store %arg8[%c0_11, %c0_12], %12 {strides = array<i32>} : memref<64x128xf32, #tpu.memory_space<vmem>>, vector<64x128xf32>,
    } else {
    }
    %c0 = arith.constant 0 : index
    %c0_1 = arith.constant 0 : index
    %3 = vector.load %arg8[%c0, %c0_1] : memref<64x128xf32, #tpu.memory_space<vmem>>, vector<64x128xf32>
    %c0_2 = arith.constant 0 : index
    %c0_3 = arith.constant 0 : index
    %4 = vector.load %arg3[%c0_2, %c0_3] : memref<64x128xbf16, #tpu.memory_space<vmem>>, vector<64x128xbf16>
    %c0_4 = arith.constant 0 : index
    %c0_5 = arith.constant 0 : index
    %5 = vector.load %arg4[%c0_4, %c0_5] : memref<128x128xbf16, #tpu.memory_space<vmem>>, vector<128x128xbf16>
    %cst = arith.constant dense<0.000000e+00> : vector<64x128xf32>
    %6 = tpu.matmul %4, %5, %cst {dimension_numbers = #tpu.dot_dimension_numbers<[1], [0], [0], [1], [0, 0, 1, 1], [], []>} : vector<64x128xbf16>, vector<128x128xbf16>, vector<64x128xf32> -> vector<64x128xf32>
    %7 = arith.addf %3, %6 : vector<64x128xf32>
    %c0_6 = arith.constant 0 : index
    %c0_7 = arith.constant 0 : index
    %8 = vector.load %arg8[%c0_6, %c0_7] : memref<64x128xf32, #tpu.memory_space<vmem>>, vector<64x128xf32>
    tpu.vector_store %arg8[%c0_6, %c0_7], %7 {strides = array<i32>} : memref<64x128xf32, #tpu.memory_space<vmem>>, vector<64x128xf32>,
    %c0_i32_8 = arith.constant 0 : i32
    %9 = arith.cmpi eq, %arg2, %c0_i32_8 : i32
    %10 = arith.extui %9 : i1 to i32
    %c0_i32_9 = arith.constant 0 : i32
    %11 = arith.cmpi ne, %10, %c0_i32_9 : i32
    scf.if %11 {
      %c0_10 = arith.constant 0 : index
      %c0_11 = arith.constant 0 : index
      %12 = vector.load %arg8[%c0_10, %c0_11] : memref<64x128xf32, #tpu.memory_space<vmem>>, vector<64x128xf32>
      %c0_12 = arith.constant 0 : index
      %c0_13 = arith.constant 0 : index
      %13 = vector.load %arg5[%c0_12, %c0_13] : memref<1x128xf32, #tpu.memory_space<vmem>>, vector<1x128xf32>
      %14 = vector.broadcast %13 : vector<1x128xf32> to vector<64x128xf32>
      %15 = arith.mulf %12, %14 : vector<64x128xf32>
      %c0_14 = arith.constant 0 : index
      %c0_15 = arith.constant 0 : index
      %16 = vector.load %arg6[%c0_14, %c0_15] : memref<1x128xf32, #tpu.memory_space<vmem>>, vector<1x128xf32>
      %17 = vector.broadcast %16 : vector<1x128xf32> to vector<64x128xf32>
      %18 = arith.addf %15, %17 : vector<64x128xf32>
      %cst_16 = arith.constant 0.000000e+00 : f32
      %19 = vector.broadcast %cst_16 : f32 to vector<64x128xf32>
      %20 = arith.maximumf %18, %19 : vector<64x128xf32>
      %21 = arith.truncf %20 : vector<64x128xf32> to vector<64x128xbf16>
      %c0_17 = arith.constant 0 : index
      %c0_18 = arith.constant 0 : index
      %22 = vector.load %arg7[%c0_17, %c0_18] : memref<64x128xbf16, #tpu.memory_space<vmem>>, vector<64x128xbf16>
      tpu.vector_store %arg7[%c0_17, %c0_18], %21 {strides = array<i32>} : memref<64x128xbf16, #tpu.memory_space<vmem>>, vector<64x128xbf16>,
    } else {
    }
    return
  }
  func.func @transform_0(%arg0: i32, %arg1: i32, %arg2: i32) -> (i32, i32) {
    %c0_i32 = arith.constant 0 : i32
    return %arg0, %arg2 : i32, i32
  }
  func.func @transform_1(%arg0: i32, %arg1: i32, %arg2: i32) -> (i32, i32) {
    %c0_i32 = arith.constant 0 : i32
    return %arg2, %arg1 : i32, i32
  }
  func.func @transform_2(%arg0: i32, %arg1: i32, %arg2: i32) -> (i32, i32) {
    %c0_i32 = arith.constant 0 : i32
    %c0_i32_0 = arith.constant 0 : i32
    return %c0_i32, %arg1 : i32, i32
  }
  func.func @transform_3(%arg0: i32, %arg1: i32, %arg2: i32) -> (i32, i32) {
    %c0_i32 = arith.constant 0 : i32
    %c0_i32_0 = arith.constant 0 : i32
    return %c0_i32, %arg1 : i32, i32
  }
  func.func @transform_4(%arg0: i32, %arg1: i32, %arg2: i32) -> (i32, i32) {
    %c0_i32 = arith.constant 0 : i32
    return %arg0, %arg1 : i32, i32
  }
}

module attributes {stable_mosaic.version = 11 : i64} {
  func.func @_mm_proj_kernel(%arg0: i32, %arg1: i32, %arg2: i32, %arg3: memref<64x128xbf16, #tpu.memory_space<vmem>>, %arg4: memref<128x128xbf16, #tpu.memory_space<vmem>>, %arg5: memref<1x128xf32, #tpu.memory_space<vmem>>, %arg6: memref<1x128xf32, #tpu.memory_space<vmem>>, %arg7: memref<64x128xbf16, #tpu.memory_space<vmem>>, %arg8: memref<128x128xbf16, #tpu.memory_space<vmem>>, %arg9: memref<1x128xf32, #tpu.memory_space<vmem>>, %arg10: memref<1x128xf32, #tpu.memory_space<vmem>>, %arg11: memref<64x128xf32, #tpu.memory_space<vmem>>, %arg12: memref<64x128xf32, #tpu.memory_space<vmem>>) attributes {dimension_semantics = [#tpu.dimension_semantics<parallel>, #tpu.dimension_semantics<parallel>, #tpu.dimension_semantics<arbitrary>], iteration_bounds = array<i64: 2, 1, 1>, scalar_prefetch = 0 : i64, scratch_operands = 1 : i64, tpu.core_type = #tpu.core_type<tc>, window_params = [{transform_indices = @transform_0, window_bounds = array<i64: 64, 128>}, {transform_indices = @transform_1, window_bounds = array<i64: 128, 128>}, {transform_indices = @transform_2, window_bounds = array<i64: 1, 128>}, {transform_indices = @transform_3, window_bounds = array<i64: 1, 128>}, {transform_indices = @transform_4, window_bounds = array<i64: 64, 128>}, {transform_indices = @transform_5, window_bounds = array<i64: 128, 128>}, {transform_indices = @transform_6, window_bounds = array<i64: 1, 128>}, {transform_indices = @transform_7, window_bounds = array<i64: 1, 128>}, {transform_indices = @transform_8, window_bounds = array<i64: 64, 128>}]} {
    %c0_i32 = arith.constant 0 : i32
    %0 = arith.cmpi eq, %arg2, %c0_i32 : i32
    %1 = arith.extui %0 : i1 to i32
    %c0_i32_0 = arith.constant 0 : i32
    %2 = arith.cmpi ne, %1, %c0_i32_0 : i32
    scf.if %2 {
      %cst_10 = arith.constant 0.000000e+00 : f32
      %12 = vector.broadcast %cst_10 : f32 to vector<64x128xf32>
      %c0_11 = arith.constant 0 : index
      %c0_12 = arith.constant 0 : index
      %13 = vector.load %arg12[%c0_11, %c0_12] : memref<64x128xf32, #tpu.memory_space<vmem>>, vector<64x128xf32>
      tpu.vector_store %arg12[%c0_11, %c0_12], %12 {strides = array<i32>} : memref<64x128xf32, #tpu.memory_space<vmem>>, vector<64x128xf32>,
    } else {
    }
    %c0 = arith.constant 0 : index
    %c0_1 = arith.constant 0 : index
    %3 = vector.load %arg12[%c0, %c0_1] : memref<64x128xf32, #tpu.memory_space<vmem>>, vector<64x128xf32>
    %c0_2 = arith.constant 0 : index
    %c0_3 = arith.constant 0 : index
    %4 = vector.load %arg3[%c0_2, %c0_3] : memref<64x128xbf16, #tpu.memory_space<vmem>>, vector<64x128xbf16>
    %c0_4 = arith.constant 0 : index
    %c0_5 = arith.constant 0 : index
    %5 = vector.load %arg4[%c0_4, %c0_5] : memref<128x128xbf16, #tpu.memory_space<vmem>>, vector<128x128xbf16>
    %cst = arith.constant dense<0.000000e+00> : vector<64x128xf32>
    %6 = tpu.matmul %4, %5, %cst {dimension_numbers = #tpu.dot_dimension_numbers<[1], [0], [0], [1], [0, 0, 1, 1], [], []>} : vector<64x128xbf16>, vector<128x128xbf16>, vector<64x128xf32> -> vector<64x128xf32>
    %7 = arith.addf %3, %6 : vector<64x128xf32>
    %c0_6 = arith.constant 0 : index
    %c0_7 = arith.constant 0 : index
    %8 = vector.load %arg12[%c0_6, %c0_7] : memref<64x128xf32, #tpu.memory_space<vmem>>, vector<64x128xf32>
    tpu.vector_store %arg12[%c0_6, %c0_7], %7 {strides = array<i32>} : memref<64x128xf32, #tpu.memory_space<vmem>>, vector<64x128xf32>,
    %c0_i32_8 = arith.constant 0 : i32
    %9 = arith.cmpi eq, %arg2, %c0_i32_8 : i32
    %10 = arith.extui %9 : i1 to i32
    %c0_i32_9 = arith.constant 0 : i32
    %11 = arith.cmpi ne, %10, %c0_i32_9 : i32
    scf.if %11 {
      %c0_10 = arith.constant 0 : index
      %c0_11 = arith.constant 0 : index
      %12 = vector.load %arg7[%c0_10, %c0_11] : memref<64x128xbf16, #tpu.memory_space<vmem>>, vector<64x128xbf16>
      %c0_12 = arith.constant 0 : index
      %c0_13 = arith.constant 0 : index
      %13 = vector.load %arg8[%c0_12, %c0_13] : memref<128x128xbf16, #tpu.memory_space<vmem>>, vector<128x128xbf16>
      %cst_14 = arith.constant dense<0.000000e+00> : vector<64x128xf32>
      %14 = tpu.matmul %12, %13, %cst_14 {dimension_numbers = #tpu.dot_dimension_numbers<[1], [0], [0], [1], [0, 0, 1, 1], [], []>} : vector<64x128xbf16>, vector<128x128xbf16>, vector<64x128xf32> -> vector<64x128xf32>
      %c0_15 = arith.constant 0 : index
      %c0_16 = arith.constant 0 : index
      %15 = vector.load %arg12[%c0_15, %c0_16] : memref<64x128xf32, #tpu.memory_space<vmem>>, vector<64x128xf32>
      %c0_17 = arith.constant 0 : index
      %c0_18 = arith.constant 0 : index
      %16 = vector.load %arg5[%c0_17, %c0_18] : memref<1x128xf32, #tpu.memory_space<vmem>>, vector<1x128xf32>
      %17 = vector.broadcast %16 : vector<1x128xf32> to vector<64x128xf32>
      %18 = arith.mulf %15, %17 : vector<64x128xf32>
      %c0_19 = arith.constant 0 : index
      %c0_20 = arith.constant 0 : index
      %19 = vector.load %arg6[%c0_19, %c0_20] : memref<1x128xf32, #tpu.memory_space<vmem>>, vector<1x128xf32>
      %20 = vector.broadcast %19 : vector<1x128xf32> to vector<64x128xf32>
      %21 = arith.addf %18, %20 : vector<64x128xf32>
      %c0_21 = arith.constant 0 : index
      %c0_22 = arith.constant 0 : index
      %22 = vector.load %arg9[%c0_21, %c0_22] : memref<1x128xf32, #tpu.memory_space<vmem>>, vector<1x128xf32>
      %23 = vector.broadcast %22 : vector<1x128xf32> to vector<64x128xf32>
      %24 = arith.mulf %14, %23 : vector<64x128xf32>
      %25 = arith.addf %21, %24 : vector<64x128xf32>
      %c0_23 = arith.constant 0 : index
      %c0_24 = arith.constant 0 : index
      %26 = vector.load %arg10[%c0_23, %c0_24] : memref<1x128xf32, #tpu.memory_space<vmem>>, vector<1x128xf32>
      %27 = vector.broadcast %26 : vector<1x128xf32> to vector<64x128xf32>
      %28 = arith.addf %25, %27 : vector<64x128xf32>
      %cst_25 = arith.constant 0.000000e+00 : f32
      %29 = vector.broadcast %cst_25 : f32 to vector<64x128xf32>
      %30 = arith.maximumf %28, %29 : vector<64x128xf32>
      %c0_26 = arith.constant 0 : index
      %c0_27 = arith.constant 0 : index
      %31 = vector.load %arg11[%c0_26, %c0_27] : memref<64x128xf32, #tpu.memory_space<vmem>>, vector<64x128xf32>
      tpu.vector_store %arg11[%c0_26, %c0_27], %30 {strides = array<i32>} : memref<64x128xf32, #tpu.memory_space<vmem>>, vector<64x128xf32>,
    } else {
    }
    return
  }
  func.func @transform_0(%arg0: i32, %arg1: i32, %arg2: i32) -> (i32, i32) {
    %c0_i32 = arith.constant 0 : i32
    return %arg0, %arg2 : i32, i32
  }
  func.func @transform_1(%arg0: i32, %arg1: i32, %arg2: i32) -> (i32, i32) {
    %c0_i32 = arith.constant 0 : i32
    return %arg2, %arg1 : i32, i32
  }
  func.func @transform_2(%arg0: i32, %arg1: i32, %arg2: i32) -> (i32, i32) {
    %c0_i32 = arith.constant 0 : i32
    %c0_i32_0 = arith.constant 0 : i32
    return %c0_i32, %arg1 : i32, i32
  }
  func.func @transform_3(%arg0: i32, %arg1: i32, %arg2: i32) -> (i32, i32) {
    %c0_i32 = arith.constant 0 : i32
    %c0_i32_0 = arith.constant 0 : i32
    return %c0_i32, %arg1 : i32, i32
  }
  func.func @transform_4(%arg0: i32, %arg1: i32, %arg2: i32) -> (i32, i32) {
    %c0_i32 = arith.constant 0 : i32
    %c0_i32_0 = arith.constant 0 : i32
    return %arg0, %c0_i32 : i32, i32
  }
  func.func @transform_5(%arg0: i32, %arg1: i32, %arg2: i32) -> (i32, i32) {
    %c0_i32 = arith.constant 0 : i32
    %c0_i32_0 = arith.constant 0 : i32
    return %c0_i32, %arg1 : i32, i32
  }
  func.func @transform_6(%arg0: i32, %arg1: i32, %arg2: i32) -> (i32, i32) {
    %c0_i32 = arith.constant 0 : i32
    %c0_i32_0 = arith.constant 0 : i32
    return %c0_i32, %arg1 : i32, i32
  }
  func.func @transform_7(%arg0: i32, %arg1: i32, %arg2: i32) -> (i32, i32) {
    %c0_i32 = arith.constant 0 : i32
    %c0_i32_0 = arith.constant 0 : i32
    return %c0_i32, %arg1 : i32, i32
  }
  func.func @transform_8(%arg0: i32, %arg1: i32, %arg2: i32) -> (i32, i32) {
    %c0_i32 = arith.constant 0 : i32
    return %arg0, %arg1 : i32, i32
  }
}

</mosaic_0001>

<bundles_post_ra>
// kernel: basic_block_forward.2
= control target key start
LH: loop header
LB: loop body
LE: loop exit
PB: predicated region body
PF: predicated region fallthrough
CT: control target
= control target key end

     0   :  { %s914_s15 = smov 0   ;;  %s916_s16 = smov 0   ;;  %s990_s0 = inlined_call_operand.vmem [shape: bf16[128,128], index: 0, kind: input, shape index: {}]   ;;  %s991_s1 = inlined_call_operand.vmem [shape: bf16[128,128], index: 1, kind: input, shape index: {}]   ;;  %s992_s2 = inlined_call_operand.vmem [shape: f32[1,128], index: 2, kind: input, shape index: {}]   ;;  %s993_s3 = inlined_call_operand.vmem [shape: f32[1,128], index: 3, kind: input, shape index: {}]   ;;  %s994_s4 = inlined_call_operand.vmem [shape: bf16[128,128], index: 4, kind: output, shape index: {}]  }
   0x1   :  { %s918_s17 = smov 0  }
   0x2 LB: > { %s33_s18 = sadd.s32 1, %s883_s16  ;;  %p717_p0 = scmp.ge.s32.totalorder %s887_s17, 1  ;;  %s887_s17 = sphi %s918_s17, %s14_s17   ;;  %s883_s16 = sphi %s916_s16, %s996_s16   ;;  %s879_s15 = sphi %s914_s15, %s995_s15  }
   0x3   : > { %p35_p1 = scmp.ge.s32.totalorder %s33_s18, 2  ;;  %p221_p2 = scmp.lt.s32.totalorder %s887_s17, 3 }
   0x5   : > { %s998_s18 = smov (%p35_p1, %s33_s18), 0  ;;  %p222_p3 = pnand %p717_p0, %p221_p2 }
   0x6   : > { %v853_v0 = vld [vmem:[%s991_s1] sm:$0xff] (!%p222_p3)   ;;  %s718_s21 = sshll.u32 (!%p222_p3), %s879_s15, 3  ;;  %v854_v1 = vld [vmem:[%s991_s1 + $0x8] sm:$0xff] (!%p222_p3)   ;;  %v855_v2 = vld [vmem:[%s991_s1 + $0x10] sm:$0xff] (!%p222_p3)  }
   0x7   : > { %225 = sbr.rel (%p222_p3) target bundleno = 263 (0x107), region = 36  ;;  %p268_p4 = scmp.lt.s32.totalorder (!%p222_p3), %s718_s21, 15  ;;  %789 = vmatprep.subr.bf16.mxu0 (!%p222_p3), %v853_v0  ;;  %813 = vmatprep.subr.bf16.mxu1 (!%p222_p3), %v853_v0  ;;  %v856_v3 = vld [vmem:[%s991_s1 + $0x18] sm:$0xff] (!%p222_p3)   ;;  %v857_v6 = vld [vmem:[%s991_s1 + $0x20] sm:$0xff] (!%p222_p3)   ;;  %v858_v7 = vld [vmem:[%s991_s1 + $0x28] sm:$0xff] (!%p222_p3)  }
   0x8   : > { %790 = vmatpush3.bf16.msra.mxu0 (!%p222_p3), %v853_v0  ;;  %821 = vmatpush3.bf16.msra.mxu1 (!%p222_p3), %v853_v0  ;;  %v859_v8 = vld [vmem:[%s991_s1 + $0x30] sm:$0xff] (!%p222_p3)   ;;  %v860_v9 = vld [vmem:[%s991_s1 + $0x38] sm:$0xff] (!%p222_p3)   ;;  %v734_v12 = vld [vmem:[%s992_s2] ss:$0 sm:$0xff] (!%p222_p3) }
   0x9   : > { %791 = vmatprep.subr.bf16.mxu0 (!%p222_p3), %v854_v1  ;;  %814 = vmatprep.subr.bf16.mxu1 (!%p222_p3), %v854_v1  ;;  %v735_v14 = vld [vmem:[%s993_s3] ss:$0 sm:$0xff] (!%p222_p3) }
   0xc   : > { %792 = vmatpush3.bf16.msra.mxu0 (!%p222_p3), %v854_v1  ;;  %822 = vmatpush3.bf16.msra.mxu1 (!%p222_p3), %v854_v1 }
   0xd   : > { %793 = vmatprep.subr.bf16.mxu0 (!%p222_p3), %v855_v2  ;;  %815 = vmatprep.subr.bf16.mxu1 (!%p222_p3), %v855_v2 }
   0xe   : > { %s1000_s21 = smov (!%p268_p4, %s718_s21), 15 }
   0xf   : > { %s719_s26 = sshll.u32 %s1000_s21, 2 }
  0x10   : > { %s949_s29 = scalar_lea.vmem %s990_s0, %s719_s26  ;;  %794 = vmatpush3.bf16.msra.mxu0 %v855_v2  ;;  %823 = vmatpush3.bf16.msra.mxu1 %v855_v2  ;;  %s298_s24 = scalar_lea.vmem %s994_s4, %s719_s26 }
  0x11   : > { %v861_v4 = vld [vmem:[%s949_s29] sm:$0xff]   ;;  %v862_v5 = vld [vmem:[%s949_s29 + $0x10] sm:$0xff]   ;;  %795 = vmatprep.subr.bf16.mxu0 %v856_v3  ;;  %816 = vmatprep.subr.bf16.mxu1 %v856_v3  ;;  %v863_v10 = vld [vmem:[%s949_s29 + $0x8] sm:$0xff]  }
  0x12   : > { %805 = vmatprep.mubr.bf16.mxu0 %v861_v4  ;;  %809 = vmatprep.mubr.bf16.mxu1 %v862_v5  ;;  %v864_v11 = vld [vmem:[%s949_s29 + $0x18] sm:$0xff]  }
  0x14   : > { %796 = vmatpush3.bf16.msra.mxu0 %v856_v3  ;;  %824 = vmatpush3.bf16.msra.mxu1 %v856_v3 }
  0x15   : > { %797 = vmatprep.subr.bf16.mxu0 %v857_v6  ;;  %817 = vmatprep.subr.bf16.mxu1 %v857_v6 }
  0x18   : > { %798 = vmatpush3.bf16.msra.mxu0 %v857_v6  ;;  %825 = vmatpush3.bf16.msra.mxu1 %v857_v6 }
  0x19   : > { %799 = vmatprep.subr.bf16.mxu0 %v858_v7  ;;  %818 = vmatprep.subr.bf16.mxu1 %v858_v7 }
  0x1c   : > { %800 = vmatpush3.bf16.msra.mxu0 %v858_v7  ;;  %826 = vmatpush3.bf16.msra.mxu1 %v858_v7 }
  0x1d   : > { %801 = vmatprep.subr.bf16.mxu0 %v859_v8  ;;  %819 = vmatprep.subr.bf16.mxu1 %v859_v8 }
  0x20   : > { %802 = vmatpush3.bf16.msra.mxu0 %v859_v8  ;;  %827 = vmatpush3.bf16.msra.mxu1 %v859_v8 }
  0x21   : > { %803 = vmatprep.subr.bf16.mxu0 %v860_v9  ;;  %820 = vmatprep.subr.bf16.mxu1 %v860_v9 }
  0x24   : > { %804 = vmatpush3.bf16.msra.mxu0 %v860_v9  ;;  %828 = vmatpush3.bf16.msra.mxu1 %v860_v9 }
  0x27   : > { %806 = vmatmul.mubr.bf16.vlgmr.msra.gmra.mrb[0].mxu0 %v863_v10  ;;  %810 = vmatmul.mubr.bf16.vlgmr.msra.gmra.mrb[0].mxu1 %v864_v11 }
  0xfa   : > { %v807_v13 = vpop.f32.mrb[0].mxu0  ;;  %v811_v15 = vpop.f32.mrb[0].mxu1 }
  0xfb   : > { %v518_v16 = vmul.f32 %v807_v13, %v734_v12  ;;  %v522_v17 = vmul.f32 %v811_v15, %v734_v12  ;;  %v451_v18 = vpop.f32.mrb[1].mxu0  ;;  %v467_v19 = vpop.f32.mrb[1].mxu1 }
  0xfc   : > { %v516_v20 = vmul.f32 %v734_v12, %v451_v18  ;;  %v520_v21 = vmul.f32 %v734_v12, %v467_v19  ;;  %v808_v22 = vpop.f32.mrb[2].mxu0  ;;  %v812_v23 = vpop.f32.mrb[2].mxu1 }
  0xfd   : > { %v533_v24 = vadd.f32 %v735_v14, %v518_v16  ;;  %v537_v25 = vadd.f32 %v735_v14, %v522_v17  ;;  %v519_v26 = vmul.f32 %v808_v22, %v734_v12  ;;  %v523_v27 = vmul.f32 %v812_v23, %v734_v12  ;;  %v454_v28 = vpop.f32.mrb[3].mxu0  ;;  %v470_v29 = vpop.f32.mrb[3].mxu1 }
  0xfe   : > { %v531_v30 = vadd.f32 %v735_v14, %v516_v20  ;;  %v535_v31 = vadd.f32 %v735_v14, %v520_v21  ;;  %v517_v32 = vmul.f32 %v734_v12, %v454_v28  ;;  %v521_v33 = vmul.f32 %v734_v12, %v470_v29 }
  0xff   : > { %v534_v34 = vadd.f32 %v735_v14, %v519_v26  ;;  %v538_v35 = vadd.f32 %v735_v14, %v523_v27  ;;  %v541_v38 = vmax.f32 %v533_v24, 0.0  ;;  %v545_v39 = vmax.f32 %v537_v25, 0.0 }
 0x100   : > { %v532_v36 = vadd.f32 %v735_v14, %v517_v32  ;;  %v536_v37 = vadd.f32 %v735_v14, %v521_v33  ;;  %v539_v42 = vmax.f32 %v531_v30, 0.0  ;;  %v543_v43 = vmax.f32 %v535_v31, 0.0 }
 0x101   : > { %v542_v40 = vmax.f32 %v534_v34, 0.0  ;;  %v546_v41 = vmax.f32 %v538_v35, 0.0 }
 0x102   : > { %v540_v44 = vmax.f32 %v532_v36, 0.0  ;;  %v544_v45 = vmax.f32 %v536_v37, 0.0 }
 0x103   : > { %v762_v46 = vpack.c.bf16 %v542_v40, %v541_v38  ;;  %v772_v47 = vpack.c.bf16 %v546_v41, %v545_v39 }
 0x104   : > { %v757_v48 = vpack.c.bf16 %v540_v44, %v539_v42  ;;  %v767_v49 = vpack.c.bf16 %v544_v45, %v543_v43 }
 0x105   : > { %774 = vst [vmem:[%s298_s24 + $0x8] sm:$0xff] %v762_v46   ;;  %776 = vst [vmem:[%s298_s24 + $0x18] sm:$0xff] %v772_v47  }
 0x106   : > { %758 = vst [vmem:[%s298_s24] sm:$0xff] %v757_v48   ;;  %775 = vst [vmem:[%s298_s24 + $0x10] sm:$0xff] %v767_v49  }
 0x107 PF: > { %s14_s17 = sadd.s32 1, %s887_s17   ;;  %s995_s15 = smov %s883_s16 }
 0x108   : > { %p11_p5 = scmp.ge.s32.totalorder %s14_s17, 4   ;;  %s996_s16 = smov %s998_s18 }
 0x10a   :  { %13 = sbr.rel (!%p11_p5) target bundleno = 2 (0x2), region = 83 }

// kernel: basic_block_forward.3
= control target key start
LH: loop header
LB: loop body
LE: loop exit
PB: predicated region body
PF: predicated region fallthrough
CT: control target
= control target key end

     0   :  { %s1339_s27 = smov 0   ;;  %s1341_s28 = smov 0   ;;  %s1461_s0 = inlined_call_operand.vmem [shape: bf16[128,128], index: 0, kind: input, shape index: {}]   ;;  %s1462_s1 = inlined_call_operand.vmem [shape: bf16[128,128], index: 1, kind: input, shape index: {}]   ;;  %s1463_s2 = inlined_call_operand.vmem [shape: f32[1,128], index: 2, kind: input, shape index: {}]   ;;  %s1464_s3 = inlined_call_operand.vmem [shape: f32[1,128], index: 3, kind: input, shape index: {}]   ;;  %s1465_s4 = inlined_call_operand.vmem [shape: bf16[128,128], index: 4, kind: input, shape index: {}]   ;;  %s1466_s5 = inlined_call_operand.vmem [shape: bf16[128,128], index: 5, kind: input, shape index: {}]   ;;  %s1467_s6 = inlined_call_operand.vmem [shape: f32[1,128], index: 6, kind: input, shape index: {}]   ;;  %s1468_s7 = inlined_call_operand.vmem [shape: f32[1,128], index: 7, kind: input, shape index: {}]   ;;  %s1469_s8 = inlined_call_operand.vmem [shape: f32[128,128], index: 8, kind: output, shape index: {}]  }
   0x1   :  { %s1343_s29 = smov 0  }
   0x2 LB: > { %s37_s30 = sadd.s32 1, %s1288_s28  ;;  %p1113_p0 = scmp.ge.s32.totalorder %s1292_s29, 1  ;;  %s1292_s29 = sphi %s1343_s29, %s18_s29   ;;  %s1288_s28 = sphi %s1341_s28, %s1471_s28   ;;  %s1284_s27 = sphi %s1339_s27, %s1470_s27  }
   0x3   : > { %p39_p1 = scmp.ge.s32.totalorder %s37_s30, 2  ;;  %p357_p2 = scmp.lt.s32.totalorder %s1292_s29, 3 }
   0x5   : > { %s1473_s30 = smov (%p39_p1, %s37_s30), 0  ;;  %p358_p3 = pnand %p1113_p0, %p357_p2 }
   0x6   : > { %v1246_v0 = vld [vmem:[%s1462_s1] sm:$0xff] (!%p358_p3)   ;;  %s1114_s11 = sshll.u32 (!%p358_p3), %s1284_s27, 3  ;;  %v1248_v2 = vld [vmem:[%s1462_s1 + $0x8] sm:$0xff] (!%p358_p3)   ;;  %v1250_v4 = vld [vmem:[%s1462_s1 + $0x10] sm:$0xff] (!%p358_p3)  }
   0x7   : > { %361 = sbr.rel (%p358_p3) target bundleno = 273 (0x111), region = 52  ;;  %v1247_v1 = vld [vmem:[%s1466_s5] sm:$0xff] (!%p358_p3)   ;;  %1174 = vmatprep.subr.bf16.mxu0 (!%p358_p3), %v1246_v0  ;;  %p427_p4 = scmp.lt.s32.totalorder (!%p358_p3), %s1114_s11, 15  ;;  %v1249_v3 = vld [vmem:[%s1466_s5 + $0x8] sm:$0xff] (!%p358_p3)   ;;  %v1251_v5 = vld [vmem:[%s1466_s5 + $0x10] sm:$0xff] (!%p358_p3)  }
   0x8   : > { %1198 = vmatprep.subr.bf16.mxu1 (!%p358_p3), %v1247_v1  ;;  %1175 = vmatpush3.bf16.msra.mxu0 (!%p358_p3), %v1246_v0  ;;  %v1252_v6 = vld [vmem:[%s1462_s1 + $0x18] sm:$0xff] (!%p358_p3)   ;;  %v1254_v8 = vld [vmem:[%s1462_s1 + $0x20] sm:$0xff] (!%p358_p3)   ;;  %v1256_v10 = vld [vmem:[%s1462_s1 + $0x28] sm:$0xff] (!%p358_p3)  }
   0x9   : > { %1199 = vmatpush3.bf16.msra.mxu1 (!%p358_p3), %v1247_v1  ;;  %1176 = vmatprep.subr.bf16.mxu0 (!%p358_p3), %v1248_v2  ;;  %v1253_v7 = vld [vmem:[%s1466_s5 + $0x18] sm:$0xff] (!%p358_p3)   ;;  %v1255_v9 = vld [vmem:[%s1466_s5 + $0x20] sm:$0xff] (!%p358_p3)   ;;  %v1257_v11 = vld [vmem:[%s1466_s5 + $0x28] sm:$0xff] (!%p358_p3)  }
   0xa   : > { %1200 = vmatprep.subr.bf16.mxu1 (!%p358_p3), %v1249_v3  ;;  %v1258_v14 = vld [vmem:[%s1462_s1 + $0x30] sm:$0xff] (!%p358_p3)   ;;  %v1260_v16 = vld [vmem:[%s1462_s1 + $0x38] sm:$0xff] (!%p358_p3)   ;;  %v1144_v24 = vld [vmem:[%s1463_s2] ss:$0 sm:$0xff] (!%p358_p3) }
   0xb   : > { %v1259_v15 = vld [vmem:[%s1466_s5 + $0x30] sm:$0xff] (!%p358_p3)   ;;  %v1261_v17 = vld [vmem:[%s1466_s5 + $0x38] sm:$0xff] (!%p358_p3)   ;;  %v1146_v25 = vld [vmem:[%s1467_s6] ss:$0 sm:$0xff] (!%p358_p3) }
   0xc   : > { %1177 = vmatpush3.bf16.msra.mxu0 (!%p358_p3), %v1248_v2  ;;  %v1145_v27 = vld [vmem:[%s1464_s3] ss:$0 sm:$0xff] (!%p358_p3) }
   0xd   : > { %1201 = vmatpush3.bf16.msra.mxu1 (!%p358_p3), %v1249_v3  ;;  %1178 = vmatprep.subr.bf16.mxu0 (!%p358_p3), %v1250_v4  ;;  %v1147_v40 = vld [vmem:[%s1468_s7] ss:$0 sm:$0xff] (!%p358_p3) }
   0xe   : > { %s1475_s11 = smov (!%p427_p4, %s1114_s11), 15  ;;  %1202 = vmatprep.subr.bf16.mxu1 %v1251_v5 }
   0xf   : > { %s1115_s26 = sshll.u32 %s1475_s11, 2  ;;  %s1119_s21 = sshll.u32 %s1475_s11, 3 }
  0x10   : > { %1179 = vmatpush3.bf16.msra.mxu0 %v1250_v4  ;;  %s1393_s15 = scalar_lea.vmem %s1461_s0, %s1115_s26  ;;  %s1401_s20 = scalar_lea.vmem %s1465_s4, %s1115_s26 }
  0x11   : > { %1203 = vmatpush3.bf16.msra.mxu1 %v1251_v5  ;;  %1180 = vmatprep.subr.bf16.mxu0 %v1252_v6  ;;  %v1262_v12 = vld [vmem:[%s1393_s15] sm:$0xff]   ;;  %v1264_v18 = vld [vmem:[%s1393_s15 + $0x8] sm:$0xff]   ;;  %v1266_v20 = vld [vmem:[%s1393_s15 + $0x10] sm:$0xff]   ;;  %s1442_s24 = scalar_lea.vmem %s1469_s8, %s1119_s21 }
  0x12   : > { %1204 = vmatprep.subr.bf16.mxu1 %v1253_v7  ;;  %v1263_v13 = vld [vmem:[%s1401_s20] sm:$0xff]   ;;  %1190 = vmatprep.mubr.bf16.mxu0 %v1262_v12  ;;  %v1265_v19 = vld [vmem:[%s1401_s20 + $0x8] sm:$0xff]   ;;  %v1267_v21 = vld [vmem:[%s1401_s20 + $0x10] sm:$0xff]  }
  0x13   : > { %1214 = vmatprep.mubr.bf16.mxu1 %v1263_v13  ;;  %v1268_v22 = vld [vmem:[%s1393_s15 + $0x18] sm:$0xff]  }
  0x14   : > { %1181 = vmatpush3.bf16.msra.mxu0 %v1252_v6  ;;  %v1269_v23 = vld [vmem:[%s1401_s20 + $0x18] sm:$0xff]  }
  0x15   : > { %1205 = vmatpush3.bf16.msra.mxu1 %v1253_v7  ;;  %1182 = vmatprep.subr.bf16.mxu0 %v1254_v8 }
  0x16   : > { %1206 = vmatprep.subr.bf16.mxu1 %v1255_v9 }
  0x18   : > { %1183 = vmatpush3.bf16.msra.mxu0 %v1254_v8 }
  0x19   : > { %1207 = vmatpush3.bf16.msra.mxu1 %v1255_v9  ;;  %1184 = vmatprep.subr.bf16.mxu0 %v1256_v10 }
  0x1a   : > { %1208 = vmatprep.subr.bf16.mxu1 %v1257_v11 }
  0x1c   : > { %1185 = vmatpush3.bf16.msra.mxu0 %v1256_v10 }
  0x1d   : > { %1209 = vmatpush3.bf16.msra.mxu1 %v1257_v11  ;;  %1186 = vmatprep.subr.bf16.mxu0 %v1258_v14 }
  0x1e   : > { %1210 = vmatprep.subr.bf16.mxu1 %v1259_v15 }
  0x20   : > { %1187 = vmatpush3.bf16.msra.mxu0 %v1258_v14 }
  0x21   : > { %1211 = vmatpush3.bf16.msra.mxu1 %v1259_v15  ;;  %1188 = vmatprep.subr.bf16.mxu0 %v1260_v16 }
  0x22   : > { %1212 = vmatprep.subr.bf16.mxu1 %v1261_v17 }
  0x24   : > { %1189 = vmatpush3.bf16.msra.mxu0 %v1260_v16 }
  0x25   : > { %1213 = vmatpush3.bf16.msra.mxu1 %v1261_v17 }
  0x27   : > { %1191 = vmatmul.mubr.bf16.vlgmr.msra.gmra.mrb[0].mxu0 %v1264_v18 }
  0x28   : > { %1215 = vmatmul.mubr.bf16.vlgmr.msra.gmra.mrb[0].mxu1 %v1265_v19  ;;  %1194 = vmatprep.mubr.bf16.mxu0 %v1266_v20 }
  0x29   : > { %1218 = vmatprep.mubr.bf16.mxu1 %v1267_v21 }
  0x2f   : > { %1195 = vmatmul.mubr.bf16.gmra.mrb[4].mxu0 %v1268_v22 }
  0x30   : > { %1219 = vmatmul.mubr.bf16.gmra.mrb[4].mxu1 %v1269_v23 }
  0xfa   : > { %v1192_v26 = vpop.f32.mrb[0].mxu0 }
  0xfb   : > { %v854_v28 = vmul.f32 %v1192_v26, %v1144_v24  ;;  %v1216_v29 = vpop.f32.mrb[0].mxu1  ;;  %v626_v30 = vpop.f32.mrb[1].mxu0 }
  0xfc   : > { %v884_v31 = vmul.f32 %v1216_v29, %v1146_v25  ;;  %v852_v32 = vmul.f32 %v1144_v24, %v626_v30  ;;  %v806_v33 = vpop.f32.mrb[1].mxu1  ;;  %v1193_v34 = vpop.f32.mrb[2].mxu0 }
  0xfd   : > { %v869_v35 = vadd.f32 %v1145_v27, %v854_v28  ;;  %v882_v36 = vmul.f32 %v1146_v25, %v806_v33  ;;  %v855_v37 = vmul.f32 %v1193_v34, %v1144_v24  ;;  %v1217_v38 = vpop.f32.mrb[2].mxu1  ;;  %v629_v39 = vpop.f32.mrb[3].mxu0 }
  0xfe   : > { %v867_v41 = vadd.f32 %v1145_v27, %v852_v32  ;;  %v853_v42 = vmul.f32 %v1144_v24, %v629_v39  ;;  %v809_v43 = vpop.f32.mrb[3].mxu1  ;;  %v885_v46 = vmul.f32 %v1217_v38, %v1146_v25 }
  0xff   : > { %v892_v44 = vadd.f32 %v884_v31, %v869_v35  ;;  %v870_v45 = vadd.f32 %v1145_v27, %v855_v37  ;;  %v883_v49 = vmul.f32 %v1146_v25, %v809_v43 }
 0x100   : > { %v890_v47 = vadd.f32 %v882_v36, %v867_v41  ;;  %v868_v48 = vadd.f32 %v1145_v27, %v853_v42 }
 0x101   : > { %v907_v50 = vadd.f32 %v1147_v40, %v892_v44  ;;  %v893_v51 = vadd.f32 %v885_v46, %v870_v45 }
 0x102   : > { %v905_v52 = vadd.f32 %v1147_v40, %v890_v47  ;;  %v891_v53 = vadd.f32 %v883_v49, %v868_v48  ;;  %v1196_v54 = vpop.f32.mrb[4].mxu0 }
 0x103   : > { %v915_v55 = vmax.f32 %v907_v50, 0.0  ;;  %v908_v56 = vadd.f32 %v1147_v40, %v893_v51  ;;  %v858_v57 = vmul.f32 %v1196_v54, %v1144_v24  ;;  %v1220_v58 = vpop.f32.mrb[4].mxu1  ;;  %v642_v59 = vpop.f32.mrb[5].mxu0 }
 0x104   : > { %v913_v60 = vmax.f32 %v905_v52, 0.0  ;;  %v906_v61 = vadd.f32 %v1147_v40, %v891_v53  ;;  %v888_v62 = vmul.f32 %v1220_v58, %v1146_v25  ;;  %v856_v63 = vmul.f32 %v1144_v24, %v642_v59  ;;  %v822_v0 = vpop.f32.mrb[5].mxu1  ;;  %v1197_v1 = vpop.f32.mrb[6].mxu0 }
 0x105   : > { %923 = vst [vmem:[%s1442_s24 + $0x10] sm:$0xff] %v915_v55  ;;  %v916_v2 = vmax.f32 %v908_v56, 0.0  ;;  %v873_v3 = vadd.f32 %v1145_v27, %v858_v57  ;;  %v886_v4 = vmul.f32 %v1146_v25, %v822_v0  ;;  %v859_v5 = vmul.f32 %v1197_v1, %v1144_v24  ;;  %v1221_v6 = vpop.f32.mrb[6].mxu1  ;;  %v645_v7 = vpop.f32.mrb[7].mxu0 }
 0x106   : > { %921 = vst [vmem:[%s1442_s24] sm:$0xff] %v913_v60  ;;  %v914_v8 = vmax.f32 %v906_v61, 0.0  ;;  %v871_v9 = vadd.f32 %v1145_v27, %v856_v63  ;;  %v857_v10 = vmul.f32 %v1144_v24, %v645_v7  ;;  %v825_v11 = vpop.f32.mrb[7].mxu1  ;;  %v889_v14 = vmul.f32 %v1221_v6, %v1146_v25 }
 0x107   : > { %924 = vst [vmem:[%s1442_s24 + $0x18] sm:$0xff] %v916_v2  ;;  %v896_v12 = vadd.f32 %v888_v62, %v873_v3  ;;  %v874_v13 = vadd.f32 %v1145_v27, %v859_v5  ;;  %v887_v17 = vmul.f32 %v1146_v25, %v825_v11 }
 0x108   : > { %922 = vst [vmem:[%s1442_s24 + $0x8] sm:$0xff] %v914_v8  ;;  %v894_v15 = vadd.f32 %v886_v4, %v871_v9  ;;  %v872_v16 = vadd.f32 %v1145_v27, %v857_v10 }
 0x109   : > { %v911_v18 = vadd.f32 %v1147_v40, %v896_v12  ;;  %v897_v19 = vadd.f32 %v889_v14, %v874_v13 }
 0x10a   : > { %v909_v20 = vadd.f32 %v1147_v40, %v894_v15  ;;  %v895_v21 = vadd.f32 %v887_v17, %v872_v16 }
 0x10b   : > { %v919_v22 = vmax.f32 %v911_v18, 0.0  ;;  %v912_v23 = vadd.f32 %v1147_v40, %v897_v19 }
 0x10c   : > { %v917_v24 = vmax.f32 %v909_v20, 0.0  ;;  %v910_v26 = vadd.f32 %v1147_v40, %v895_v21 }
 0x10d   : > { %927 = vst [vmem:[%s1442_s24 + $0x30] sm:$0xff] %v919_v22  ;;  %v920_v28 = vmax.f32 %v912_v23, 0.0 }
 0x10e   : > { %925 = vst [vmem:[%s1442_s24 + $0x20] sm:$0xff] %v917_v24  ;;  %v918_v29 = vmax.f32 %v910_v26, 0.0 }
 0x10f   : > { %928 = vst [vmem:[%s1442_s24 + $0x38] sm:$0xff] %v920_v28 }
 0x110   : > { %926 = vst [vmem:[%s1442_s24 + $0x28] sm:$0xff] %v918_v29 }
 0x111 PF: > { %s18_s29 = sadd.s32 1, %s1292_s29   ;;  %s1470_s27 = smov %s1288_s28 }
 0x112   : > { %p15_p5 = scmp.ge.s32.totalorder %s18_s29, 4   ;;  %s1471_s28 = smov %s1473_s30 }
 0x114   :  { %17 = sbr.rel (!%p15_p5) target bundleno = 2 (0x2), region = 111 }

</bundles_post_ra>
